<compile_context>
chip_gen: v6e
topology: v6e:2x2x1
jax: 0.10.0
libtpu: 0.0.40
codegen_flags: <defaults>
</compile_context>

<pallas_src>
import functools

import jax
import jax.numpy as jnp
from jax import lax
from jax.experimental import pallas as pl
from jax.experimental.pallas import tpu as pltpu


def _vmem_budget():
    """Generation-aware (per-block bytes, vmem_limit_bytes)."""
    cap = 64 * 1024 * 1024                      # conservative fallback (v7x VMEM/TC)
    try:
        cap = int(pltpu.get_tpu_info().vmem_capacity_bytes)
    except Exception:
        pass
    if cap <= 64 * 1024 * 1024:
        # v7x-class: 64 MiB physical VMEM per TC.  8 MiB blocks double-buffer to
        # 16 MiB per pipelined array; 48 MiB scoped limit leaves compiler headroom.
        return 8 * 1024 * 1024, 48 * 1024 * 1024
    # v5e/v6e-class: 128 MiB physical VMEM.  16 MiB blocks, 64 MiB scoped limit.
    return 16 * 1024 * 1024, 64 * 1024 * 1024


def _choose_hw_tile(hw, c, itemsize, block_bytes):
    """Lane tile for the spatial axis: full extent if small, else a multiple of 128."""
    max_elems = max(128, block_bytes // max(1, c * itemsize))
    if hw <= max_elems:
        return hw                               # single tile == full dim (always legal)
    return max(128, (max_elems // 128) * 128)


def _spatial_sum_kernel(x_ref, sum_ref, acc_ref, *, hw_total, hw_tile):
    # x_ref block: (1, C, hw_tile); sum_ref block: (1, C, 1) f32;
    # acc_ref: (C, 1) f32 resident scratch across the "arbitrary" HW axis.
    #
    # Note on the accumulator: the per-tile reduce is left as a single
    # vectorized jnp.sum (VALU adds across lane vregs + one XLU cross-lane
    # reduce per 8 rows).  A fully lane-dense (C, 128) accumulator was
    # considered but a chunked ref-slice loop under-runs v7x DMA for small C
    # and a (C, hw_tile) -> (C, k, 128) reshape forces a relayout; with the
    # larger blocks the once-per-tile XLU/store tax is hidden under the DMA.
    t = pl.program_id(1)
    last = pl.num_programs(1) - 1

    @pl.when(t == 0)
    def _():
        acc_ref[...] = jnp.zeros_like(acc_ref)

    if hw_total % hw_tile == 0:
        # Every tile is full: plain vectorized accumulate, no mask work at all.
        acc_ref[...] += jnp.sum(x_ref[0], axis=-1, keepdims=True,
                                dtype=jnp.float32)
    else:
        # Ragged spatial extent: only the LAST tile pays the mask
        # (iota + compare + where); all full tiles take the fast path.
        @pl.when(t < last)
        def _():
            acc_ref[...] += jnp.sum(x_ref[0], axis=-1, keepdims=True,
                                    dtype=jnp.float32)

        @pl.when(t == last)
        def _():
            x = x_ref[0]                                        # (C, hw_tile)
            lane = lax.broadcasted_iota(jnp.int32, x.shape, 1)
            x = jnp.where(t * hw_tile + lane < hw_total, x, jnp.zeros_like(x))
            acc_ref[...] += jnp.sum(x, axis=-1, keepdims=True,
                                    dtype=jnp.float32)

    @pl.when(t == last)
    def _():
        sum_ref[0] = acc_ref[...]                               # (C, 1) spatial sum


def _gate_mlp_kernel(s_ref, w1_ref, b1_ref, w2_ref, b2_ref, g_ref, *, inv_hw):
    # Gridless call: all operands are tiny and fully resident in VMEM.
    # s_ref: (B, C) f32 spatial sums; w1: (C/4, C); b1: (1, C/4);
    # w2: (C, C/4); b2: (1, C); g_ref: (B, C) f32 gates.
    feats = s_ref[...] * inv_hw                                 # (B, C) spatial means
    h1 = lax.dot_general(feats, w1_ref[...], (((1,), (1,)), ((), ())),
                         preferred_element_type=jnp.float32) + b1_ref[...]
    h1 = jnp.maximum(h1, 0.0)                                   # (B, C/4)
    h2 = lax.dot_general(h1, w2_ref[...], (((1,), (1,)), ((), ())),
                         preferred_element_type=jnp.float32) + b2_ref[...]
    h2 = jnp.maximum(h2, 0.0)                                   # (B, C)
    g_ref[...] = jax.nn.sigmoid(h2)


def _broadcast_kernel(g_ref, o_ref):
    # Cast the tiny (C, 1) gate column first, then broadcast lane-dense and
    # store the full output tile unmasked.  (If Mosaic ever materializes the
    # broadcast as a VMEM temporary instead of reusing one lane-broadcast vreg
    # set, switch to an explicit 128-lane-chunk store loop.)
    s = g_ref[0].astype(o_ref.dtype)                            # (C, 1)
    o_ref[0] = jnp.broadcast_to(s, o_ref.shape[1:])             # (C, hw_tile)


def channel_wise_attention(x, w1, b1, w2, b2, *, hw_tile=None):
    """x: (B, C, H, W) NCHW.  Returns the (B, C, H, W) channel-attention map."""
    B, C, H, W = x.shape
    HW = H * W
    Cr = w1.shape[0]                      # C // 4

    x_flat = x.reshape(B, C, HW)
    block_bytes, vmem_limit = _vmem_budget()
    if hw_tile is None:
        hw_tile = _choose_hw_tile(HW, C, x.dtype.itemsize, block_bytes)
    n_hw = pl.cdiv(HW, hw_tile)

    # ---- pass 1: tiled spatial sums -> (B, C, 1) f32 ----
    sums = pl.pallas_call(
        functools.partial(_spatial_sum_kernel, hw_total=HW, hw_tile=hw_tile),
        out_shape=jax.ShapeDtypeStruct((B, C, 1), jnp.float32),
        grid_spec=pltpu.PrefetchScalarGridSpec(
            num_scalar_prefetch=0,
            grid=(B, n_hw),
            in_specs=[pl.BlockSpec((1, C, hw_tile), lambda b, t: (b, 0, t))],
            out_specs=pl.BlockSpec((1, C, 1), lambda b, t: (b, 0, 0)),
            scratch_shapes=[pltpu.VMEM((C, 1), jnp.float32)],
        ),
        compiler_params=pltpu.CompilerParams(
            dimension_semantics=("parallel", "arbitrary"),
            vmem_limit_bytes=vmem_limit),
    )(x_flat)

    # ---- gate MLP: once, batched over B (off the per-tile critical path) ----
    gates = pl.pallas_call(
        functools.partial(_gate_mlp_kernel, inv_hw=1.0 / HW),
        out_shape=jax.ShapeDtypeStruct((B, C), jnp.float32),
    )(sums.reshape(B, C), w1, b1.reshape(1, Cr), w2, b2.reshape(1, C))
    gates = gates.reshape(B, C, 1)

    # ---- pass 2: lane-dense broadcast of the gates to (B, C, HW) ----
    out_flat = pl.pallas_call(
        _broadcast_kernel,
        out_shape=jax.ShapeDtypeStruct((B, C, HW), x.dtype),
        grid_spec=pltpu.PrefetchScalarGridSpec(
            num_scalar_prefetch=0,
            grid=(B, n_hw),
            in_specs=[pl.BlockSpec((1, C, 1), lambda b, t: (b, 0, 0))],
            out_specs=pl.BlockSpec((1, C, hw_tile), lambda b, t: (b, 0, t)),
        ),
        compiler_params=pltpu.CompilerParams(
            dimension_semantics=("parallel", "parallel"),
            vmem_limit_bytes=vmem_limit),
    )(gates)

    return out_flat.reshape(B, C, H, W)


def _init_linear(key, out_features, in_features):
    # Deterministic init mimicking torch.nn.Linear (uniform +/- 1/sqrt(fan_in)).
    kw, kb = jax.random.split(key)
    bound = 1.0 / jnp.sqrt(jnp.float32(in_features))
    w = jax.random.uniform(kw, (out_features, in_features), jnp.float32,
                           minval=-bound, maxval=bound)
    b = jax.random.uniform(kb, (out_features,), jnp.float32,
                           minval=-bound, maxval=bound)
    return w, b


def _reference(x, w1, b1, w2, b2):
    # Plain-JAX reference matching the PyTorch forward.
    feats = jnp.mean(x, axis=(2, 3))                      # (B, C)
    feats = jnp.maximum(feats @ w1.T + b1, 0.0)           # (B, C/4)
    feats = jnp.maximum(feats @ w2.T + b2, 0.0)           # (B, C)
    feats = jax.nn.sigmoid(feats)                         # (B, C)
    return jnp.broadcast_to(feats[:, :, None, None], x.shape)


if __name__ == "__main__":
    base_key = jax.random.PRNGKey(0)

    def run_case(B, C, H, W, hw_tile=None):
        kx, k1, k2 = jax.random.split(
            jax.random.fold_in(base_key, B * 10000 + C * 100 + H), 3)
        x = jax.random.normal(kx, (B, C, H, W), jnp.float32)
        w1, b1 = _init_linear(k1, C // 4, C)
        w2, b2 = _init_linear(k2, C, C // 4)

        out = jax.block_until_ready(
            channel_wise_attention(x, w1, b1, w2, b2, hw_tile=hw_tile))
        ref = _reference(x, w1, b1, w2, b2)
        assert out.shape == (B, C, H, W)
        assert jnp.allclose(out, ref, atol=1e-5, rtol=1e-5), \
            float(jnp.max(jnp.abs(out - ref)))

    run_case(2, 8, 16, 16)                  # default: single HW tile per batch
    run_case(2, 8, 16, 16, hw_tile=128)     # multi-tile reduce, even division
    run_case(2, 8, 10, 13, hw_tile=128)     # ragged last tile (masked only on last)
    run_case(1, 8, 16, 16)                  # B=1 path

    print("KERNEL_OK")
</pallas_src>

<mosaic_0001>
module attributes {stable_mosaic.version = 11 : i64} {
  func.func @_spatial_sum_kernel(%arg0: i32, %arg1: i32, %arg2: memref<1x8x256xf32, #tpu.memory_space<vmem>>, %arg3: memref<1x8x1xf32, #tpu.memory_space<vmem>>, %arg4: memref<8x1xf32, #tpu.memory_space<vmem>>) attributes {dimension_semantics = [#tpu.dimension_semantics<parallel>, #tpu.dimension_semantics<arbitrary>], iteration_bounds = array<i64: 2, 1>, scalar_prefetch = 0 : i64, scratch_operands = 1 : i64, tpu.core_type = #tpu.core_type<tc>, window_params = [{transform_indices = @transform_0, window_bounds = array<i64: 1, 8, 256>}, {transform_indices = @transform_1, window_bounds = array<i64: 1, 8, 1>}]} {
    %c0_i32 = arith.constant 0 : i32
    %0 = arith.cmpi eq, %arg1, %c0_i32 : i32
    %1 = arith.extui %0 : i1 to i32
    %c0_i32_0 = arith.constant 0 : i32
    %2 = arith.cmpi ne, %1, %c0_i32_0 : i32
    scf.if %2 {
      %cst_9 = arith.constant 0.000000e+00 : f32
      %13 = vector.broadcast %cst_9 : f32 to vector<8x1xf32>
      %c0_10 = arith.constant 0 : index
      %c0_11 = arith.constant 0 : index
      %14 = vector.load %arg4[%c0_10, %c0_11] : memref<8x1xf32, #tpu.memory_space<vmem>>, vector<8x1xf32>
      tpu.vector_store %arg4[%c0_10, %c0_11], %13 {strides = array<i32>} : memref<8x1xf32, #tpu.memory_space<vmem>>, vector<8x1xf32>,
    } else {
    }
    %c0 = arith.constant 0 : index
    %c0_1 = arith.constant 0 : index
    %3 = vector.load %arg4[%c0, %c0_1] : memref<8x1xf32, #tpu.memory_space<vmem>>, vector<8x1xf32>
    %c0_2 = arith.constant 0 : index
    %c0_3 = arith.constant 0 : index
    %c0_4 = arith.constant 0 : index
    %4 = vector.load %arg2[%c0_2, %c0_3, %c0_4] : memref<1x8x256xf32, #tpu.memory_space<vmem>>, vector<1x8x256xf32>
    %5 = vector.shape_cast %4 : vector<1x8x256xf32> to vector<8x256xf32>
    %cst = arith.constant dense<0.000000e+00> : vector<8xf32>
    %6 = vector.multi_reduction <add>, %5, %cst [1] : vector<8x256xf32> to vector<8xf32>
    %7 = vector.shape_cast %6 : vector<8xf32> to vector<8x1xf32>
    %8 = arith.addf %3, %7 : vector<8x1xf32>
    %c0_5 = arith.constant 0 : index
    %c0_6 = arith.constant 0 : index
    %9 = vector.load %arg4[%c0_5, %c0_6] : memref<8x1xf32, #tpu.memory_space<vmem>>, vector<8x1xf32>
    tpu.vector_store %arg4[%c0_5, %c0_6], %8 {strides = array<i32>} : memref<8x1xf32, #tpu.memory_space<vmem>>, vector<8x1xf32>,
    %c0_i32_7 = arith.constant 0 : i32
    %10 = arith.cmpi eq, %arg1, %c0_i32_7 : i32
    %11 = arith.extui %10 : i1 to i32
    %c0_i32_8 = arith.constant 0 : i32
    %12 = arith.cmpi ne, %11, %c0_i32_8 : i32
    scf.if %12 {
      %c0_9 = arith.constant 0 : index
      %c0_10 = arith.constant 0 : index
      %13 = vector.load %arg4[%c0_9, %c0_10] : memref<8x1xf32, #tpu.memory_space<vmem>>, vector<8x1xf32>
      %c0_11 = arith.constant 0 : index
      %c0_12 = arith.constant 0 : index
      %c0_13 = arith.constant 0 : index
      %14 = vector.load %arg3[%c0_11, %c0_12, %c0_13] : memref<1x8x1xf32, #tpu.memory_space<vmem>>, vector<1x8x1xf32>
      %15 = vector.shape_cast %14 : vector<1x8x1xf32> to vector<8x1xf32>
      %16 = vector.shape_cast %13 : vector<8x1xf32> to vector<1x8x1xf32>
      tpu.vector_store %arg3[%c0_11, %c0_12, %c0_13], %16 {strides = array<i32>} : memref<1x8x1xf32, #tpu.memory_space<vmem>>, vector<1x8x1xf32>,
    } else {
    }
    return
  }
  func.func @transform_0(%arg0: i32, %arg1: i32) -> (i32, i32, i32) {
    %c0_i32 = arith.constant 0 : i32
    %c0_i32_0 = arith.constant 0 : i32
    return %arg0, %c0_i32, %arg1 : i32, i32, i32
  }
  func.func @transform_1(%arg0: i32, %arg1: i32) -> (i32, i32, i32) {
    %c0_i32 = arith.constant 0 : i32
    %c0_i32_0 = arith.constant 0 : i32
    %c0_i32_1 = arith.constant 0 : i32
    return %arg0, %c0_i32, %c0_i32_0 : i32, i32, i32
  }
}

</mosaic_0001>

<bundles_post_ra>
// kernel: tpu_custom_call.1
= control target key start
LH: loop header
LB: loop body
LE: loop exit
PB: predicated region body
PF: predicated region fallthrough
CT: control target
= control target key end

     0   :  { %6 = vsyncpa [#allocation4], 0  ;;  %s510_s0 = inlined_call_operand.hbm [shape: f32[2,8,256], index: 0, kind: input, shape index: {}]   ;;  %s511_s1 = inlined_call_operand.vmem [shape: f32[2,8,1], index: 1, kind: output, shape index: {}]  }
   0x1   :  { %8 = vsyncpa [#allocation4 + $0x1], 0  ;;  %s407_s6 = smov 0   ;;  %s409_s7 = smov 0  }
   0x2   :  { %s411_s8 = smov 0   ;;  %s413_s9 = smov 0  }
   0x3   :  { %s415_s10 = smov 0   ;;  %s417_s11 = smov 0  }
   0x4 LB: > { %s246_s12 = sadd.s32 4294967295, %s393_s11   ;;  %s26_s13 = sadd.s32 1, %s389_s10  ;;  %s393_s11 = sphi %s417_s11, %s14_s11   ;;  %s389_s10 = sphi %s415_s10, %s519_s10   ;;  %s385_s9 = sphi %s413_s9, %s518_s9   ;;  %s381_s8 = sphi %s411_s8, %s517_s8   ;;  %s377_s7 = sphi %s409_s7, %s516_s7   ;;  %s373_s6 = sphi %s407_s6, %s515_s6  }
   0x5   : > { %p28_p0 = scmp.ge.s32.totalorder %s26_s13, 2  ;;  %s35_s14 = sadd.s32 1, %s381_s8 }
   0x6   : > { %p42_p1 = scmp.ne.s32.totalorder %s381_s8, %s377_s7  ;;  %p43_p2 = scmp.eq.s32.totalorder %s393_s11, 0 }
   0x7   : > { %s521_s13 = smov (%p28_p0, %s26_s13), 0  ;;  %p48_p4 = scmp.ne.s32.totalorder %s377_s7, %s373_s6 }
   0x8   : > { %p443_p3 = por %p43_p2, %p42_p1  ;;  %s30_s16 = ssub.s32 %s389_s10, %s521_s13 }
   0x9   : > { %p49_p5 = scmp.eq.s32.totalorder %s246_s12, 0  ;;  %p33_p6 = scmp.eq.s32.totalorder %s30_s16, 0 }
   0xa   : > { %p265_p8 = scmp.lt.s32.totalorder %s393_s11, 2  ;;  %s98_s19 = sand.u32 1, %s381_s8  }
   0xb   : > { %p450_p7 = por %p49_p5, %p48_p4  ;;  %s258_s20 = sshll.u32 %s389_s10, 8 }
   0xc   : > { %s456_s18 = scalar_select %p33_p6, %s381_s8, %s35_s14  }
   0xd   : > { %s250_s21 = sshll.u32 %s98_s19, 4  ;;  %s110_s24 = scalar_lea.hbm %s510_s0, %s258_s20 }
   0xe   : > { %s102_s25 = scalar_lea.vmem [#allocation3], %s250_s21  ;;  %p465_p9 = pnand %p265_p8, %p443_p3 }
   0xf   : > { %s112_s26 = sshll.u32 %s102_s25, 4  ;;  %p253_p10 = scmp.ge.s32.totalorder %s393_s11, 1  ;;  %s113_s26 = int_to_ptr.vmem [resolvable:$true] %s112_s26 }
  0x10   : > { %p117_p11 = scmp.lt.s32.totalorder %s393_s11, 3  ;;  %s99_s28 = scalar_lea.sflag [#allocation4], %s98_s19 }
  0x11   : > { %p317_p12 = pneg %p465_p9  ;;  %s328_s29 = scalar_lea.vmem %s113_s26, 256 }
  0x12   : > { %p329_p13 = scmp.ne.s32.totalorder %s113_s26, %s328_s29  ;;  %s395_s30 = smov [#allocation3]  }
  0x13   : > { %s333_s2 = sshll.u32 %s395_s30, 4  ;;  %s334_s2 = int_to_ptr.vmem [resolvable:$false] %s333_s2 }
  0x14   : > { %p331_p0 = pnand %p329_p13, %p317_p12  ;;  %s335_s3 = scalar_lea.vmem %s334_s2, 512 }
  0x15   : > { %p336_p2 = scmp.lt.s32.totalorder %s113_s26, %s334_s2  ;;  %p337_p3 = scmp.lt.s32.totalorder %s335_s3, %s328_s29 }
  0x16   : > { %p332_p1 = pneg %p331_p0 }
  0x17   : > { %p338_p4 = por %p337_p3, %p336_p2 }
  0x19   : > { %p339_p5 = pnand %p338_p4, %p332_p1 }
  0x1b   : > { %342 = shalt.err (!%p339_p5)
}
  0x1c   : > { %264 = dma.hbm_to_vmem [thread:$0]  (!%p465_p9), %s110_s24, 256, %s113_s26, %s99_s28  }
  0x1d   : > { %p118_p6 = pnand %p253_p10, %p117_p11 }
  0x1e   : > { %s123_s4 = sand.u32 (!%p118_p6), 1, %s377_s7  }
  0x1f   : > { %121 = sbr.rel (%p118_p6) target bundleno = 189 (0xbd), region = 24  ;;  %s254_s5 = sshll.u32 (!%p118_p6), %s123_s4, 4 }
  0x20   : > { %s124_s6 = scalar_lea.sflag (!%p118_p6), [#allocation4], %s123_s4  ;;  %s127_s12 = scalar_lea.vmem (!%p118_p6), [#allocation3], %s254_s5 }
  0x24   : > { %368 = dma.done.wait (%p450_p7), %s124_s6, 256  }
  0x25   : > { %370 = vsyncadd (%p450_p7), %s124_s6, 4294967040  ;;  %vm154_vm0 = vcmask 7168   ;;  %v396_v0 = vmov 0.0   ;;  %v157_v1 = vld [vmem:[%s127_s12] sm:$0xff]  ;;  %v158_v2 = vld [vmem:[%s127_s12 + $0x8] sm:$0xff]  ;;  %p146_p8 = scmp.lt.s32.totalorder %s385_s9, 1 }
  0x26   : > { %155 = vst.msk [vmem:[#allocation2] sm:$0xff] %vm154_vm0, %v396_v0  ;;  %v159_v3 = vadd.f32 %v158_v2, %v157_v1 }
  0x27   : > { %s523_s9 = smov (!%p146_p8, %s385_s9), 1 }
  0x28   : > { %160 = vadd.xlane.f32.xlu0 %v159_v3  ;;  %s255_s14 = sshll.u32 %s523_s9, 3 }
  0x29   : > { %s149_s17 = scalar_lea.vmem %s511_s1, %s255_s14 }
  0x2d   : > { %v156_v4 = vld [vmem:[#allocation2] sm:$0xff] }
  0xb1   : > { %v161_v5 = vpop.xlane.xlu0 %160 }
  0xb2   : > { %v162_v6 = vadd.f32 %v161_v5, %v156_v4 }
  0xb4   : > { %164 = vst.msk [vmem:[#allocation2] sm:$0xff] %vm154_vm0, %v162_v6 }
  0xbb   : > { %v168_v7 = vld [vmem:[#allocation2] sm:$0xff] }
  0xbc   : > { %169 = vst.msk [vmem:[%s149_s17] sm:$0xff] %vm154_vm0, %v168_v7 }
  0xbd PF: > { %s14_s11 = sadd.s32 1, %s393_s11   ;;  %s515_s6 = smov %s377_s7 }
  0xbe   : > { %p11_p7 = scmp.ge.s32.totalorder %s14_s11, 4   ;;  %s516_s7 = smov %s381_s8 }
  0xbf   : > { %s517_s8 = smov %s456_s18  ;;  %s518_s9 = smov %s389_s10 }
  0xc0   : > { %s519_s10 = smov %s521_s13  ;;  %13 = sbr.rel (!%p11_p7) target bundleno = 4 (0x4), region = 72 }
  0xc5   :  { %189 = vsyncpa [#allocation4], 1 }
  0xc6   :  { %191 = vsyncpa [#allocation4 + $0x1], 1 }

</bundles_post_ra>
